<compile_context>
chip_gen: v5e
topology: v5e:2x2
jax: 0.10.0
libtpu: 0.0.40
codegen_flags: <defaults>
</compile_context>

<pallas_src>
import functools

import jax
import jax.numpy as jnp
from jax.experimental import pallas as pl
from jax.experimental.pallas import tpu as pltpu

HIDDEN1 = 150          # logical dims (match the PyTorch module)
HIDDEN2 = 75
H1_PAD = 256           # lane-aligned padded dims used inside the kernel
H2_PAD = 128
LANE = 128
SUBLANE = 8


def _round_up(x: int, m: int) -> int:
    return (x + m - 1) // m * m


def _mlp_kernel(x_ref, w1_ref, b1_ref, w2_ref, b2_ref, w3_ref, b3_ref, o_ref):
    """Agent.forward: Linear -> ReLU -> Linear -> ReLU -> Linear (logits, no softmax)."""
    x = x_ref[...]
    h1 = jnp.dot(x, w1_ref[...], preferred_element_type=jnp.float32) + b1_ref[...]
    h1 = jnp.maximum(h1, 0.0)
    h2 = jnp.dot(h1, w2_ref[...], preferred_element_type=jnp.float32) + b2_ref[...]
    h2 = jnp.maximum(h2, 0.0)
    logits = jnp.dot(h2, w3_ref[...], preferred_element_type=jnp.float32) + b3_ref[...]
    o_ref[...] = logits.astype(o_ref.dtype)


@functools.partial(jax.jit, static_argnames=("action_dim",))
def agent_forward(state, padded_params, action_dim):
    """Run the Agent MLP forward pass with a batch-tiled Pallas kernel.

    state:         (B, state_dim) float32
    padded_params: dict of lane-aligned, zero-padded arrays
                   w1 (S, 256), b1 (1, 256), w2 (256, 128), b2 (1, 128),
                   w3 (128, A_pad), b3 (1, A_pad)
    returns:       (B, action_dim) float32 logits
    """
    B, S = state.shape
    a_pad = padded_params["w3"].shape[1]

    # Batch tile: amortize per-step overhead; small batches collapse to one tile.
    tb = min(512, _round_up(B, SUBLANE))
    b_pad = _round_up(B, tb)
    if b_pad != B:
        state = jnp.pad(state, ((0, b_pad - B), (0, 0)))

    resident = lambda shape: pl.BlockSpec(shape, lambda i: (0, 0))

    flops = 2 * b_pad * (S * H1_PAD + H1_PAD * H2_PAD + H2_PAD * a_pad)
    bytes_accessed = 4 * (
        b_pad * S + b_pad * a_pad
        + S * H1_PAD + H1_PAD + H1_PAD * H2_PAD + H2_PAD + H2_PAD * a_pad + a_pad
    )

    out = pl.pallas_call(
        _mlp_kernel,
        out_shape=jax.ShapeDtypeStruct((b_pad, a_pad), jnp.float32),
        grid_spec=pltpu.PrefetchScalarGridSpec(
            num_scalar_prefetch=0,
            grid=(b_pad // tb,),
            in_specs=[
                pl.BlockSpec((tb, S), lambda i: (i, 0)),        # activations: pipelined
                resident((S, H1_PAD)), resident((1, H1_PAD)),   # weights/biases: resident
                resident((H1_PAD, H2_PAD)), resident((1, H2_PAD)),
                resident((H2_PAD, a_pad)), resident((1, a_pad)),
            ],
            out_specs=pl.BlockSpec((tb, a_pad), lambda i: (i, 0)),
        ),
        compiler_params=pltpu.CompilerParams(
            dimension_semantics=("parallel",),
        ),
        cost_estimate=pl.CostEstimate(
            flops=flops, transcendentals=0, bytes_accessed=bytes_accessed
        ),
    )(
        state,
        padded_params["w1"], padded_params["b1"],
        padded_params["w2"], padded_params["b2"],
        padded_params["w3"], padded_params["b3"],
    )
    return out[:B, :action_dim]


def init_params(key, state_dim, action_dim):
    """Deterministic init mimicking PyTorch nn.Linear (uniform +/- 1/sqrt(fan_in))."""
    def linear(key, fan_in, fan_out):
        kw, kb = jax.random.split(key)
        bound = 1.0 / jnp.sqrt(float(fan_in))
        w = jax.random.uniform(kw, (fan_in, fan_out), jnp.float32, -bound, bound)
        b = jax.random.uniform(kb, (1, fan_out), jnp.float32, -bound, bound)
        return w, b

    k1, k2, k3 = jax.random.split(key, 3)
    w1, b1 = linear(k1, state_dim, HIDDEN1)
    w2, b2 = linear(k2, HIDDEN1, HIDDEN2)
    w3, b3 = linear(k3, HIDDEN2, action_dim)
    return {"w1": w1, "b1": b1, "w2": w2, "b2": b2, "w3": w3, "b3": b3}


def pad_params(p, action_dim):
    """Zero-pad weights/biases to lane-aligned shapes (done once, outside the hot loop).

    Zero-padded hidden columns produce 0 after ReLU and the corresponding
    zero-padded rows of the next weight contribute 0, so numerics are unchanged.
    """
    a_pad = _round_up(max(action_dim, 1), LANE)

    def pad2(a, rows, cols):
        return jnp.pad(a, ((0, rows - a.shape[0]), (0, cols - a.shape[1])))

    return {
        "w1": pad2(p["w1"], p["w1"].shape[0], H1_PAD),
        "b1": pad2(p["b1"], 1, H1_PAD),
        "w2": pad2(p["w2"], H1_PAD, H2_PAD),
        "b2": pad2(p["b2"], 1, H2_PAD),
        "w3": pad2(p["w3"], H2_PAD, a_pad),
        "b3": pad2(p["b3"], 1, a_pad),
    }


def reference_forward(state, p):
    h1 = jnp.maximum(state @ p["w1"] + p["b1"], 0.0)
    h2 = jnp.maximum(h1 @ p["w2"] + p["b2"], 0.0)
    return h2 @ p["w3"] + p["b3"]


if __name__ == "__main__":
    key = jax.random.PRNGKey(0)
    state_dim, action_dim, batch = 4, 2, 8   # e.g. CartPole-like agent
    kp, kx = jax.random.split(key)
    params = init_params(kp, state_dim, action_dim)
    padded = pad_params(params, action_dim)
    state = jax.random.normal(kx, (batch, state_dim), dtype=jnp.float32)

    logits = agent_forward(state, padded, action_dim)
    logits = jax.block_until_ready(logits)

    ref = reference_forward(state, params)
    assert logits.shape == (batch, action_dim)
    assert jnp.allclose(logits, ref, atol=1e-4, rtol=1e-4), "mismatch vs reference"

    # Also exercise a larger, non-tile-multiple batch to cover the padded/grid path.
    big_state = jax.random.normal(kx, (1030, state_dim), dtype=jnp.float32)
    big_logits = jax.block_until_ready(agent_forward(big_state, padded, action_dim))
    big_ref = reference_forward(big_state, params)
    assert big_logits.shape == (1030, action_dim)
    assert jnp.allclose(big_logits, big_ref, atol=1e-4, rtol=1e-4), "mismatch (big batch)"

    print("KERNEL_OK")
</pallas_src>

<mosaic_0001>
module attributes {stable_mosaic.version = 11 : i64} {
  func.func @_mlp_kernel(%arg0: i32, %arg1: memref<8x4xf32, #tpu.memory_space<vmem>>, %arg2: memref<4x256xf32, #tpu.memory_space<vmem>>, %arg3: memref<1x256xf32, #tpu.memory_space<vmem>>, %arg4: memref<256x128xf32, #tpu.memory_space<vmem>>, %arg5: memref<1x128xf32, #tpu.memory_space<vmem>>, %arg6: memref<128x128xf32, #tpu.memory_space<vmem>>, %arg7: memref<1x128xf32, #tpu.memory_space<vmem>>, %arg8: memref<8x128xf32, #tpu.memory_space<vmem>>) attributes {dimension_semantics = [#tpu.dimension_semantics<parallel>], iteration_bounds = array<i64: 1>, scalar_prefetch = 0 : i64, scratch_operands = 0 : i64, tpu.core_type = #tpu.core_type<tc>, window_params = [{transform_indices = @transform_0, window_bounds = array<i64: 8, 4>}, {pipeline_mode = #tpu.pipeline_mode<synchronous>, transform_indices = @transform_1, window_bounds = array<i64: 4, 256>}, {pipeline_mode = #tpu.pipeline_mode<synchronous>, transform_indices = @transform_2, window_bounds = array<i64: 1, 256>}, {pipeline_mode = #tpu.pipeline_mode<synchronous>, transform_indices = @transform_3, window_bounds = array<i64: 256, 128>}, {pipeline_mode = #tpu.pipeline_mode<synchronous>, transform_indices = @transform_4, window_bounds = array<i64: 1, 128>}, {pipeline_mode = #tpu.pipeline_mode<synchronous>, transform_indices = @transform_5, window_bounds = array<i64: 128, 128>}, {pipeline_mode = #tpu.pipeline_mode<synchronous>, transform_indices = @transform_6, window_bounds = array<i64: 1, 128>}, {transform_indices = @transform_7, window_bounds = array<i64: 8, 128>}]} {
    %c0 = arith.constant 0 : index
    %c0_0 = arith.constant 0 : index
    %0 = vector.load %arg1[%c0, %c0_0] : memref<8x4xf32, #tpu.memory_space<vmem>>, vector<8x4xf32>
    %c0_1 = arith.constant 0 : index
    %c0_2 = arith.constant 0 : index
    %1 = vector.load %arg2[%c0_1, %c0_2] : memref<4x256xf32, #tpu.memory_space<vmem>>, vector<4x256xf32>
    %cst = arith.constant dense<0.000000e+00> : vector<8x256xf32>
    %2 = tpu.matmul %0, %1, %cst {dimension_numbers = #tpu.dot_dimension_numbers<[1], [0], [0], [1], [0, 0, 1, 1], [], []>} : vector<8x4xf32>, vector<4x256xf32>, vector<8x256xf32> -> vector<8x256xf32>
    %c0_3 = arith.constant 0 : index
    %c0_4 = arith.constant 0 : index
    %3 = vector.load %arg3[%c0_3, %c0_4] : memref<1x256xf32, #tpu.memory_space<vmem>>, vector<1x256xf32>
    %4 = vector.broadcast %3 : vector<1x256xf32> to vector<8x256xf32>
    %5 = arith.addf %2, %4 : vector<8x256xf32>
    %cst_5 = arith.constant 0.000000e+00 : f32
    %6 = vector.broadcast %cst_5 : f32 to vector<8x256xf32>
    %7 = arith.maximumf %5, %6 : vector<8x256xf32>
    %c0_6 = arith.constant 0 : index
    %c0_7 = arith.constant 0 : index
    %8 = vector.load %arg4[%c0_6, %c0_7] : memref<256x128xf32, #tpu.memory_space<vmem>>, vector<256x128xf32>
    %cst_8 = arith.constant dense<0.000000e+00> : vector<8x128xf32>
    %9 = tpu.matmul %7, %8, %cst_8 {dimension_numbers = #tpu.dot_dimension_numbers<[1], [0], [0], [1], [0, 0, 1, 1], [], []>} : vector<8x256xf32>, vector<256x128xf32>, vector<8x128xf32> -> vector<8x128xf32>
    %c0_9 = arith.constant 0 : index
    %c0_10 = arith.constant 0 : index
    %10 = vector.load %arg5[%c0_9, %c0_10] : memref<1x128xf32, #tpu.memory_space<vmem>>, vector<1x128xf32>
    %11 = vector.broadcast %10 : vector<1x128xf32> to vector<8x128xf32>
    %12 = arith.addf %9, %11 : vector<8x128xf32>
    %cst_11 = arith.constant 0.000000e+00 : f32
    %13 = vector.broadcast %cst_11 : f32 to vector<8x128xf32>
    %14 = arith.maximumf %12, %13 : vector<8x128xf32>
    %c0_12 = arith.constant 0 : index
    %c0_13 = arith.constant 0 : index
    %15 = vector.load %arg6[%c0_12, %c0_13] : memref<128x128xf32, #tpu.memory_space<vmem>>, vector<128x128xf32>
    %cst_14 = arith.constant dense<0.000000e+00> : vector<8x128xf32>
    %16 = tpu.matmul %14, %15, %cst_14 {dimension_numbers = #tpu.dot_dimension_numbers<[1], [0], [0], [1], [0, 0, 1, 1], [], []>} : vector<8x128xf32>, vector<128x128xf32>, vector<8x128xf32> -> vector<8x128xf32>
    %c0_15 = arith.constant 0 : index
    %c0_16 = arith.constant 0 : index
    %17 = vector.load %arg7[%c0_15, %c0_16] : memref<1x128xf32, #tpu.memory_space<vmem>>, vector<1x128xf32>
    %18 = vector.broadcast %17 : vector<1x128xf32> to vector<8x128xf32>
    %19 = arith.addf %16, %18 : vector<8x128xf32>
    %c0_17 = arith.constant 0 : index
    %c0_18 = arith.constant 0 : index
    %20 = vector.load %arg8[%c0_17, %c0_18] : memref<8x128xf32, #tpu.memory_space<vmem>>, vector<8x128xf32>
    tpu.vector_store %arg8[%c0_17, %c0_18], %19 {strides = array<i32>} : memref<8x128xf32, #tpu.memory_space<vmem>>, vector<8x128xf32>,
    return
  }
  func.func @transform_0(%arg0: i32) -> (i32, i32) {
    %c0_i32 = arith.constant 0 : i32
    %c0_i32_0 = arith.constant 0 : i32
    return %arg0, %c0_i32 : i32, i32
  }
  func.func @transform_1(%arg0: i32) -> (i32, i32) {
    %c0_i32 = arith.constant 0 : i32
    %c0_i32_0 = arith.constant 0 : i32
    %c0_i32_1 = arith.constant 0 : i32
    return %c0_i32, %c0_i32_0 : i32, i32
  }
  func.func @transform_2(%arg0: i32) -> (i32, i32) {
    %c0_i32 = arith.constant 0 : i32
    %c0_i32_0 = arith.constant 0 : i32
    %c0_i32_1 = arith.constant 0 : i32
    return %c0_i32, %c0_i32_0 : i32, i32
  }
  func.func @transform_3(%arg0: i32) -> (i32, i32) {
    %c0_i32 = arith.constant 0 : i32
    %c0_i32_0 = arith.constant 0 : i32
    %c0_i32_1 = arith.constant 0 : i32
    return %c0_i32, %c0_i32_0 : i32, i32
  }
  func.func @transform_4(%arg0: i32) -> (i32, i32) {
    %c0_i32 = arith.constant 0 : i32
    %c0_i32_0 = arith.constant 0 : i32
    %c0_i32_1 = arith.constant 0 : i32
    return %c0_i32, %c0_i32_0 : i32, i32
  }
  func.func @transform_5(%arg0: i32) -> (i32, i32) {
    %c0_i32 = arith.constant 0 : i32
    %c0_i32_0 = arith.constant 0 : i32
    %c0_i32_1 = arith.constant 0 : i32
    return %c0_i32, %c0_i32_0 : i32, i32
  }
  func.func @transform_6(%arg0: i32) -> (i32, i32) {
    %c0_i32 = arith.constant 0 : i32
    %c0_i32_0 = arith.constant 0 : i32
    %c0_i32_1 = arith.constant 0 : i32
    return %c0_i32, %c0_i32_0 : i32, i32
  }
  func.func @transform_7(%arg0: i32) -> (i32, i32) {
    %c0_i32 = arith.constant 0 : i32
    %c0_i32_0 = arith.constant 0 : i32
    return %arg0, %c0_i32 : i32, i32
  }
}

</mosaic_0001>

<bundles_post_ra>
// kernel: agent_forward.1
= control target key start
LH: loop header
LB: loop body
LE: loop exit
PB: predicated region body
PF: predicated region fallthrough
CT: control target
= control target key end

     0   :  { %12 = vsyncpa [#allocation3], 0  ;;  %s379_s0 = inlined_call_operand.vmem [shape: f32[8,4], index: 0, kind: input, shape index: {}]   ;;  %s380_s1 = inlined_call_operand.vmem [shape: f32[4,256], index: 1, kind: input, shape index: {}]   ;;  %s381_s2 = inlined_call_operand.vmem [shape: f32[1,256], index: 2, kind: input, shape index: {}]   ;;  %s382_s3 = inlined_call_operand.hbm [shape: f32[256,128], index: 3, kind: input, shape index: {}]   ;;  %s383_s4 = inlined_call_operand.vmem [shape: f32[1,128], index: 4, kind: input, shape index: {}]   ;;  %s384_s5 = inlined_call_operand.hbm [shape: f32[128,128], index: 5, kind: input, shape index: {}]   ;;  %s385_s6 = inlined_call_operand.vmem [shape: f32[1,128], index: 6, kind: input, shape index: {}]   ;;  %s386_s7 = inlined_call_operand.vmem [shape: f32[8,128], index: 7, kind: output, shape index: {}]  }
   0x1   :  { %s24_s26 = sshll.u32 %s382_s3, 4  ;;  %s25_s26 = int_to_ptr.hbm [resolvable:$true] %s24_s26 }
   0x2   :  { %13 = vsyncpa [#allocation5], 0  ;;  %s307_s27 = smov [#allocation2]   ;;  %s39_s8 = sshll.u32 %s384_s5, 4  ;;  %s40_s8 = int_to_ptr.hbm [resolvable:$true] %s39_s8 }
   0x3   :  { %s26_s28 = sshll.u32 %s307_s27, 4  ;;  %s308_s9 = smov 128   ;;  %s27_s28 = int_to_ptr.vmem [resolvable:$true] %s26_s28 }
   0x4   :  { %s309_s10 = smov 8   ;;  %s310_s11 = smov [#allocation4]  }
   0x5   :  { %32 = dma.hbm_to_vmem [thread:$0]  %s25_s26, 4096, %s27_s28, [#allocation3], %s308_s9, %s308_s9, %s309_s10  }
   0x6   :  { %s41_s12 = sshll.u32 %s310_s11, 4  ;;  %s42_s12 = int_to_ptr.vmem [resolvable:$true] %s41_s12 }
   0x7   :  { %47 = dma.hbm_to_vmem [thread:$0]  %s40_s8, 2048, %s42_s12, [#allocation5], %s308_s9, %s308_s9, %s309_s10  }
   0x8   :  { %303 = dma.done.wait [#allocation3], 4096  }
   0x9   :  { %304 = vsyncadd [#allocation3], 4294963200 }
   0xa   :  { %305 = dma.done.wait [#allocation5], 2048  }
   0xb   :  { %306 = vsyncadd [#allocation5], 4294965248  ;;  %v59_v0 = vld [vmem:[%s380_s1] sm:$0xff]  ;;  %v135_v2 = vld [vmem:[#allocation2 + $0x70] sm:$0xff]  ;;  %vm74_vm0 = vcmask 1043456   ;;  %vm70_vm1 = vcmask 31744  }
   0xc   :  { %v136_v1 = vld [vmem:[#allocation2 + $0x78] sm:$0xff]  ;;  %67 = vst [vmem:[#allocation1] ss:$2 sm:$0xff] %v59_v0  ;;  %v134_v3 = vld [vmem:[#allocation2 + $0x68] sm:$0xff]  ;;  %v151_v5 = vld [vmem:[#allocation2 + $0xf0] sm:$0xff] }
   0xd   :  { %157 = vmatpush.msra.mxu2 %v136_v1  ;;  %v152_v4 = vld [vmem:[#allocation2 + $0xf8] sm:$0xff]  ;;  %v133_v6 = vld [vmem:[#allocation2 + $0x60] sm:$0xff]  ;;  %v150_v7 = vld [vmem:[#allocation2 + $0xe8] sm:$0xff] }
   0xe   :  { %177 = vmatpush.msra.mxu3 %v152_v4  ;;  %v132_v8 = vld [vmem:[#allocation2 + $0x58] sm:$0xff]  ;;  %v131_v10 = vld [vmem:[#allocation2 + $0x50] sm:$0xff]  ;;  %v149_v11 = vld [vmem:[#allocation2 + $0xe0] sm:$0xff] }
   0xf   :  { %158 = vmatpush.msra.mxu2 %v135_v2  ;;  %v58_v9 = vld [vmem:[%s379_s0] sm:$0xff]  ;;  %v130_v15 = vld [vmem:[#allocation2 + $0x48] sm:$0xff]  ;;  %v147_v16 = vld [vmem:[#allocation2 + $0xd0] sm:$0xff] }
  0x10   :  { %178 = vmatpush.msra.mxu3 %v151_v5  ;;  %v148_v14 = vld [vmem:[#allocation2 + $0xd8] sm:$0xff]  ;;  %v129_v17 = vld [vmem:[#allocation2 + $0x40] sm:$0xff]  ;;  %v146_v18 = vld [vmem:[#allocation2 + $0xc8] sm:$0xff] }
  0x11   :  { %159 = vmatpush.msra.mxu2 %v134_v3  ;;  %v128_v19 = vld [vmem:[#allocation2 + $0x38] sm:$0xff]  ;;  %v145_v20 = vld [vmem:[#allocation2 + $0xc0] sm:$0xff]  ;;  %v127_v21 = vld [vmem:[#allocation2 + $0x30] sm:$0xff] }
  0x12   :  { %179 = vmatpush.msra.mxu3 %v150_v7  ;;  %v144_v22 = vld [vmem:[#allocation2 + $0xb8] sm:$0xff]  ;;  %v126_v23 = vld [vmem:[#allocation2 + $0x28] sm:$0xff]  ;;  %v125_v24 = vld [vmem:[#allocation2 + $0x20] sm:$0xff] }
  0x13   :  { %160 = vmatpush.msra.mxu2 %v133_v6  ;;  %v68_v12 = vld.sshfl [vmem:[#allocation1] sm:$0xff pattern:$0x75316420]  ;;  %v69_v13 = vld.sshfl [vmem:[#allocation1 + $0x8] sm:$0xff pattern:$0x75316420] }
  0x14   :  { %245 = vmatpush.msk.msra.mxu1 %vm74_vm0, %v68_v12  ;;  %180 = vmatpush.msra.mxu3 %v149_v11  ;;  %v124_v25 = vld [vmem:[#allocation2 + $0x18] sm:$0xff]  ;;  %v123_v26 = vld [vmem:[#allocation2 + $0x10] sm:$0xff]  ;;  %v122_v28 = vld [vmem:[#allocation2 + $0x8] sm:$0xff] }
  0x15   :  { %161 = vmatpush.msra.mxu2 %v132_v8  ;;  %246 = vmatmul.msk.f32.vlgmr.msra.gmra.mxu1 %vm70_vm1, %v58_v9  ;;  %v143_v27 = vld [vmem:[#allocation2 + $0xb0] sm:$0xff]  ;;  %v142_v29 = vld [vmem:[#allocation2 + $0xa8] sm:$0xff]  ;;  %v121_v30 = vld [vmem:[#allocation2] sm:$0xff] }
  0x16   :  { %247 = vmatpush.msk.msrb.mxu1 %vm74_vm0, %v69_v13  ;;  %181 = vmatpush.msra.mxu3 %v148_v14  ;;  %v141_v31 = vld [vmem:[#allocation2 + $0xa0] sm:$0xff]  ;;  %v140_v32 = vld [vmem:[#allocation2 + $0x98] sm:$0xff]  ;;  %v139_v33 = vld [vmem:[#allocation2 + $0x90] sm:$0xff] }
  0x17   :  { %162 = vmatpush.msra.mxu2 %v131_v10  ;;  %v138_v34 = vld [vmem:[#allocation2 + $0x88] sm:$0xff]  ;;  %v137_v35 = vld [vmem:[#allocation2 + $0x80] sm:$0xff]  ;;  %v213_v36 = vld [vmem:[#allocation4 + $0x78] sm:$0xff] }
  0x18   :  { %182 = vmatpush.msra.mxu3 %v147_v16  ;;  %v212_v37 = vld [vmem:[#allocation4 + $0x70] sm:$0xff]  ;;  %218 = vmatpush.msra.mxu0 %v213_v36  ;;  %v211_v38 = vld [vmem:[#allocation4 + $0x68] sm:$0xff]  ;;  %v210_v39 = vld [vmem:[#allocation4 + $0x60] sm:$0xff] }
  0x19   :  { %163 = vmatpush.msra.mxu2 %v130_v15  ;;  %v209_v40 = vld [vmem:[#allocation4 + $0x58] sm:$0xff]  ;;  %v208_v41 = vld [vmem:[#allocation4 + $0x50] sm:$0xff]  ;;  %v207_v42 = vld [vmem:[#allocation4 + $0x48] sm:$0xff] }
  0x1a   :  { %183 = vmatpush.msra.mxu3 %v146_v18  ;;  %219 = vmatpush.msra.mxu0 %v212_v37  ;;  %v206_v43 = vld [vmem:[#allocation4 + $0x40] sm:$0xff]  ;;  %v60_v44 = vld [vmem:[%s381_s2] sm:$0x3]  ;;  %v204_v54 = vld [vmem:[#allocation4 + $0x30] sm:$0xff] }
  0x1b   :  { %164 = vmatpush.msra.mxu2 %v129_v17  ;;  %v205_v45 = vld [vmem:[#allocation4 + $0x38] sm:$0xff]  ;;  %v62_v46 = vperm.slane %v60_v44, 0  ;;  %v63_v50 = vperm.slane %v60_v44, 1  ;;  %v203_v55 = vld [vmem:[#allocation4 + $0x28] sm:$0xff]  ;;  %v202_v56 = vld [vmem:[#allocation4 + $0x20] sm:$0xff] }
  0x1c   :  { %184 = vmatpush.msra.mxu3 %v145_v20  ;;  %220 = vmatpush.msra.mxu0 %v211_v38  ;;  %v201_v57 = vld [vmem:[#allocation4 + $0x18] sm:$0xff]  ;;  %v200_v58 = vld [vmem:[#allocation4 + $0x10] sm:$0xff]  ;;  %v199_v59 = vld [vmem:[#allocation4 + $0x8] sm:$0xff] }
  0x1d   :  { %165 = vmatpush.msra.mxu2 %v128_v19  ;;  %248 = vmatmul.msk.f32.vlgmr.msrb.gmra.mxu1 %vm70_vm1, %v58_v9  ;;  %v198_v60 = vld [vmem:[#allocation4] sm:$0xff]  ;;  %v253_v61 = vld [vmem:[%s383_s4] ss:$0 sm:$0xff] }
  0x1e   :  { %185 = vmatpush.msra.mxu3 %v144_v22  ;;  %221 = vmatpush.msra.mxu0 %v210_v39  ;;  %v254_v3 = vld [vmem:[%s385_s6] ss:$0 sm:$0xff] }
  0x1f   :  { %166 = vmatpush.msra.mxu2 %v127_v21 }
  0x20   :  { %186 = vmatpush.msra.mxu3 %v143_v27  ;;  %222 = vmatpush.msra.mxu0 %v209_v40 }
  0x21   :  { %167 = vmatpush.msra.mxu2 %v126_v23 }
  0x22   :  { %187 = vmatpush.msra.mxu3 %v142_v29  ;;  %223 = vmatpush.msra.mxu0 %v208_v41 }
  0x23   :  { %168 = vmatpush.msra.mxu2 %v125_v24 }
  0x24   :  { %188 = vmatpush.msra.mxu3 %v141_v31  ;;  %224 = vmatpush.msra.mxu0 %v207_v42 }
  0x25   :  { %169 = vmatpush.msra.mxu2 %v124_v25 }
  0x26   :  { %189 = vmatpush.msra.mxu3 %v140_v32  ;;  %225 = vmatpush.msra.mxu0 %v206_v43 }
  0x27   :  { %170 = vmatpush.msra.mxu2 %v123_v26 }
  0x28   :  { %190 = vmatpush.msra.mxu3 %v139_v33  ;;  %226 = vmatpush.msra.mxu0 %v205_v45 }
  0x29   :  { %171 = vmatpush.msra.mxu2 %v122_v28 }
  0x2a   :  { %191 = vmatpush.msra.mxu3 %v138_v34  ;;  %227 = vmatpush.msra.mxu0 %v204_v54 }
  0x2b   :  { %172 = vmatpush.msra.mxu2 %v121_v30 }
  0x2c   :  { %192 = vmatpush.msra.mxu3 %v137_v35  ;;  %228 = vmatpush.msra.mxu0 %v203_v55 }
  0x2e   :  { %229 = vmatpush.msra.mxu0 %v202_v56 }
  0x30   :  { %230 = vmatpush.msra.mxu0 %v201_v57 }
  0x32   :  { %231 = vmatpush.msra.mxu0 %v200_v58 }
  0x34   :  { %232 = vmatpush.msra.mxu0 %v199_v59 }
  0x36   :  { %233 = vmatpush.msra.mxu0 %v198_v60 }
  0x92   :  { %v96_v47 = vpop.f32.mrf.mxu1 }
  0x93   :  { %v97_v48 = vadd.f32 %v96_v47, %v62_v46 }
  0x95   :  { %v119_v49 = vmax.f32 %v97_v48, 0.0 }
  0x97   :  { %173 = vmatmul.f32.vlgmr.msra.gmra.mxu2 %v119_v49 }
  0x9a   :  { %v116_v51 = vpop.f32.mrf.mxu1 }
  0x9b   :  { %v117_v52 = vadd.f32 %v116_v51, %v63_v50 }
  0x9d   :  { %v120_v53 = vmax.f32 %v117_v52, 0.0 }
  0x9f   :  { %193 = vmatmul.f32.vlgmr.msra.gmra.mxu3 %v120_v53 }
 0x11a   :  { %v174_v62 = vpop.f32.mrf.mxu2 }
 0x11b   :  { %v175_v63 = vadd.f32 %v253_v61, %v174_v62 }
 0x122   :  { %v194_v0 = vpop.f32.mrf.mxu3 }
 0x123   :  { %v195_v1 = vadd.f32 %v194_v0, %v175_v63 }
 0x125   :  { %v197_v2 = vmax.f32 %v195_v1, 0.0 }
 0x127   :  { %234 = vmatmul.f32.vlgmr.msra.gmra.mxu0 %v197_v2 }
 0x1a4   :  { %v235_v4 = vpop.f32.mrf.mxu0 }
 0x1a5   :  { %v236_v5 = vadd.f32 %v254_v3, %v235_v4 }
 0x1a7   :  { %238 = vst [vmem:[%s386_s7] sm:$0xff] %v236_v5 }
 0x1a8   :  { %243 = vsyncpa [#allocation3], 1 }
 0x1a9   :  { %244 = vsyncpa [#allocation5], 1 }

</bundles_post_ra>
